<compile_context>
chip_gen: v7x
topology: tpu7x:2x2x1
jax: 0.10.0
libtpu: 0.0.40
codegen_flags: <defaults>
</compile_context>

<pallas_src>
import jax
import jax.numpy as jnp
from jax.experimental import pallas as pl
from jax.experimental.pallas import tpu as pltpu

HIDDEN = 128


def _round_up(x, m):
    return (x + m - 1) // m * m


def _choose_tb(batch, block_batch):
    """Pick a batch tile: multiple of 8 sublanes (f32 x tiles), capped so the
    grid has >= 2 steps when the batch supports it (v7x megacore), or the full
    batch (legal full-dim block) for tiny batches."""
    target = max(8, _round_up(block_batch, 8))
    if batch >= 16:
        target = min(target, _round_up(pl.cdiv(batch, 2), 8))
    if batch <= target:
        return batch  # single block == full array dim -> always a legal shape
    return target


def qnet_kernel(x_ref, w1_ref, b1_ref, w2_ref, b2_ref, w3_ref, b3_ref, o_ref):
    # x arrives f32; cast to bf16 in-kernel. MXU accumulates in f32; biases and
    # ReLU in f32 (v5e-safe); final store is bf16, lane-dense (128 cols).
    x = x_ref[...].astype(jnp.bfloat16)
    h1 = jnp.dot(x, w1_ref[...], preferred_element_type=jnp.float32) + b1_ref[...]
    h1 = jnp.maximum(h1, 0.0).astype(jnp.bfloat16)
    h2 = jnp.dot(h1, w2_ref[...], preferred_element_type=jnp.float32) + b2_ref[...]
    h2 = jnp.maximum(h2, 0.0).astype(jnp.bfloat16)
    out = jnp.dot(h2, w3_ref[...], preferred_element_type=jnp.float32) + b3_ref[...]
    o_ref[...] = out.astype(o_ref.dtype)


def qnetwork_forward(x, params, output_dim, *, block_batch=2048):
    """x: (B, input_dim) float32. params: dict of bf16 weights / f32 biases
    (w3/b3 zero-padded to a multiple of 128 output columns).
    Returns (B, output_dim) float32."""
    w1, b1, w2, b2, w3, b3 = (params[k] for k in ("w1", "b1", "w2", "b2", "w3", "b3"))
    B, input_dim = x.shape
    hidden = w1.shape[1]
    out_pad = w3.shape[1]  # padded, multiple of 128

    tb = _choose_tb(B, block_batch)
    grid = (pl.cdiv(B, tb),)

    flops = 2 * B * (input_dim * hidden + hidden * hidden + hidden * out_pad)
    bytes_accessed = (
        B * input_dim * 4                           # x (f32)
        + (w1.size + w2.size + w3.size) * 2         # weights (bf16)
        + (b1.size + b2.size + b3.size) * 4         # biases (f32)
        + B * out_pad * 2                           # output (bf16)
    )

    out = pl.pallas_call(
        qnet_kernel,
        out_shape=jax.ShapeDtypeStruct((B, out_pad), jnp.bfloat16),
        grid=grid,
        in_specs=[
            pl.BlockSpec((tb, input_dim), lambda i: (i, 0)),       # x: tiled on batch
            pl.BlockSpec((input_dim, hidden), lambda i: (0, 0)),   # weights/biases:
            pl.BlockSpec((1, hidden), lambda i: (0, 0)),           # resident in VMEM
            pl.BlockSpec((hidden, hidden), lambda i: (0, 0)),
            pl.BlockSpec((1, hidden), lambda i: (0, 0)),
            pl.BlockSpec((hidden, out_pad), lambda i: (0, 0)),
            pl.BlockSpec((1, out_pad), lambda i: (0, 0)),
        ],
        out_specs=pl.BlockSpec((tb, out_pad), lambda i: (i, 0)),
        compiler_params=pltpu.CompilerParams(
            dimension_semantics=("parallel",),
            vmem_limit_bytes=32 << 20,
        ),
        cost_estimate=pl.CostEstimate(
            flops=flops, transcendentals=0, bytes_accessed=bytes_accessed
        ),
    )(x, w1, b1, w2, b2, w3, b3)

    # TODO(synk): ideally fuse this slice (and any downstream argmax) into the
    # consumer; pad columns are exactly zero so masking is trivial.
    return out[:, :output_dim].astype(jnp.float32)


def init_params(key, input_dim, output_dim, hidden=HIDDEN):
    """PyTorch-Linear-style uniform(-1/sqrt(fan_in), 1/sqrt(fan_in)) init.
    Weights stored (in_features, out_features) in bf16; biases f32.
    W3/b3 zero-padded to a multiple of 128 output columns (lane-dense store)."""
    ks = jax.random.split(key, 6)

    def linear(kw, kb, fan_in, fan_out):
        bound = 1.0 / jnp.sqrt(jnp.float32(fan_in))
        w = jax.random.uniform(kw, (fan_in, fan_out), jnp.float32, -bound, bound)
        b = jax.random.uniform(kb, (1, fan_out), jnp.float32, -bound, bound)
        return w, b

    w1, b1 = linear(ks[0], ks[1], input_dim, hidden)
    w2, b2 = linear(ks[2], ks[3], hidden, hidden)
    w3, b3 = linear(ks[4], ks[5], hidden, output_dim)

    out_pad = _round_up(max(output_dim, 128), 128)
    w3 = jnp.pad(w3, ((0, 0), (0, out_pad - output_dim)))
    b3 = jnp.pad(b3, ((0, 0), (0, out_pad - output_dim)))

    return {
        "w1": w1.astype(jnp.bfloat16), "b1": b1,
        "w2": w2.astype(jnp.bfloat16), "b2": b2,
        "w3": w3.astype(jnp.bfloat16), "b3": b3,
    }


def qnetwork_ref(x, p, output_dim):
    """Pure-JAX reference using the same bf16-quantized weights (f32 math)."""
    w1 = p["w1"].astype(jnp.float32)
    w2 = p["w2"].astype(jnp.float32)
    w3 = p["w3"].astype(jnp.float32)
    xb = x.astype(jnp.bfloat16).astype(jnp.float32)
    h1 = jnp.maximum(xb @ w1 + p["b1"], 0.0)
    h2 = jnp.maximum(h1 @ w2 + p["b2"], 0.0)
    out = h2 @ w3 + p["b3"]
    return out[:, :output_dim]


if __name__ == "__main__":
    key = jax.random.PRNGKey(0)
    k_x, k_x2, k_p = jax.random.split(key, 3)

    input_dim = 16   # mujoco-style observation dim
    output_dim = 4   # discretized actions
    params = init_params(k_p, input_dim, output_dim)

    # Small batch (exercises the single full-dim block + output-padding paths).
    batch = 2
    x = jax.random.normal(k_x, (batch, input_dim), dtype=jnp.float32)
    out = jax.block_until_ready(qnetwork_forward(x, params, output_dim))
    ref = qnetwork_ref(x, params, output_dim)
    assert out.shape == (batch, output_dim)
    assert jnp.allclose(out, ref, atol=3e-2, rtol=3e-2), float(
        jnp.max(jnp.abs(out - ref))
    )

    # Larger batch (exercises the multi-tile "parallel" grid + ragged last block).
    batch2 = 320
    x2 = jax.random.normal(k_x2, (batch2, input_dim), dtype=jnp.float32)
    out2 = jax.block_until_ready(
        qnetwork_forward(x2, params, output_dim, block_batch=128)
    )
    ref2 = qnetwork_ref(x2, params, output_dim)
    assert out2.shape == (batch2, output_dim)
    assert jnp.allclose(out2, ref2, atol=3e-2, rtol=3e-2), float(
        jnp.max(jnp.abs(out2 - ref2))
    )

    print("KERNEL_OK")
</pallas_src>

<mosaic_0001>
module attributes {stable_mosaic.version = 11 : i64} {
  func.func @qnet_kernel(%arg0: i32, %arg1: memref<2x16xf32, #tpu.memory_space<vmem>>, %arg2: memref<16x128xbf16, #tpu.memory_space<vmem>>, %arg3: memref<1x128xf32, #tpu.memory_space<vmem>>, %arg4: memref<128x128xbf16, #tpu.memory_space<vmem>>, %arg5: memref<1x128xf32, #tpu.memory_space<vmem>>, %arg6: memref<128x128xbf16, #tpu.memory_space<vmem>>, %arg7: memref<1x128xf32, #tpu.memory_space<vmem>>, %arg8: memref<2x128xbf16, #tpu.memory_space<vmem>>) attributes {dimension_semantics = [#tpu.dimension_semantics<parallel>], iteration_bounds = array<i64: 1>, scalar_prefetch = 0 : i64, scratch_operands = 0 : i64, tpu.core_type = #tpu.core_type<tc>, window_params = [{transform_indices = @transform_0, window_bounds = array<i64: 2, 16>}, {pipeline_mode = #tpu.pipeline_mode<synchronous>, transform_indices = @transform_1, window_bounds = array<i64: 16, 128>}, {pipeline_mode = #tpu.pipeline_mode<synchronous>, transform_indices = @transform_2, window_bounds = array<i64: 1, 128>}, {pipeline_mode = #tpu.pipeline_mode<synchronous>, transform_indices = @transform_3, window_bounds = array<i64: 128, 128>}, {pipeline_mode = #tpu.pipeline_mode<synchronous>, transform_indices = @transform_4, window_bounds = array<i64: 1, 128>}, {pipeline_mode = #tpu.pipeline_mode<synchronous>, transform_indices = @transform_5, window_bounds = array<i64: 128, 128>}, {pipeline_mode = #tpu.pipeline_mode<synchronous>, transform_indices = @transform_6, window_bounds = array<i64: 1, 128>}, {transform_indices = @transform_7, window_bounds = array<i64: 2, 128>}]} {
    %c0 = arith.constant 0 : index
    %c0_0 = arith.constant 0 : index
    %0 = vector.load %arg1[%c0, %c0_0] : memref<2x16xf32, #tpu.memory_space<vmem>>, vector<2x16xf32>
    %1 = arith.truncf %0 : vector<2x16xf32> to vector<2x16xbf16>
    %c0_1 = arith.constant 0 : index
    %c0_2 = arith.constant 0 : index
    %2 = vector.load %arg2[%c0_1, %c0_2] : memref<16x128xbf16, #tpu.memory_space<vmem>>, vector<16x128xbf16>
    %cst = arith.constant dense<0.000000e+00> : vector<2x128xf32>
    %3 = tpu.matmul %1, %2, %cst {dimension_numbers = #tpu.dot_dimension_numbers<[1], [0], [0], [1], [0, 0, 1, 1], [], []>} : vector<2x16xbf16>, vector<16x128xbf16>, vector<2x128xf32> -> vector<2x128xf32>
    %c0_3 = arith.constant 0 : index
    %c0_4 = arith.constant 0 : index
    %4 = vector.load %arg3[%c0_3, %c0_4] : memref<1x128xf32, #tpu.memory_space<vmem>>, vector<1x128xf32>
    %5 = vector.broadcast %4 : vector<1x128xf32> to vector<2x128xf32>
    %6 = arith.addf %3, %5 : vector<2x128xf32>
    %cst_5 = arith.constant 0.000000e+00 : f32
    %7 = vector.broadcast %cst_5 : f32 to vector<2x128xf32>
    %8 = arith.maximumf %6, %7 : vector<2x128xf32>
    %9 = arith.truncf %8 : vector<2x128xf32> to vector<2x128xbf16>
    %c0_6 = arith.constant 0 : index
    %c0_7 = arith.constant 0 : index
    %10 = vector.load %arg4[%c0_6, %c0_7] : memref<128x128xbf16, #tpu.memory_space<vmem>>, vector<128x128xbf16>
    %cst_8 = arith.constant dense<0.000000e+00> : vector<2x128xf32>
    %11 = tpu.matmul %9, %10, %cst_8 {dimension_numbers = #tpu.dot_dimension_numbers<[1], [0], [0], [1], [0, 0, 1, 1], [], []>} : vector<2x128xbf16>, vector<128x128xbf16>, vector<2x128xf32> -> vector<2x128xf32>
    %c0_9 = arith.constant 0 : index
    %c0_10 = arith.constant 0 : index
    %12 = vector.load %arg5[%c0_9, %c0_10] : memref<1x128xf32, #tpu.memory_space<vmem>>, vector<1x128xf32>
    %13 = vector.broadcast %12 : vector<1x128xf32> to vector<2x128xf32>
    %14 = arith.addf %11, %13 : vector<2x128xf32>
    %cst_11 = arith.constant 0.000000e+00 : f32
    %15 = vector.broadcast %cst_11 : f32 to vector<2x128xf32>
    %16 = arith.maximumf %14, %15 : vector<2x128xf32>
    %17 = arith.truncf %16 : vector<2x128xf32> to vector<2x128xbf16>
    %c0_12 = arith.constant 0 : index
    %c0_13 = arith.constant 0 : index
    %18 = vector.load %arg6[%c0_12, %c0_13] : memref<128x128xbf16, #tpu.memory_space<vmem>>, vector<128x128xbf16>
    %cst_14 = arith.constant dense<0.000000e+00> : vector<2x128xf32>
    %19 = tpu.matmul %17, %18, %cst_14 {dimension_numbers = #tpu.dot_dimension_numbers<[1], [0], [0], [1], [0, 0, 1, 1], [], []>} : vector<2x128xbf16>, vector<128x128xbf16>, vector<2x128xf32> -> vector<2x128xf32>
    %c0_15 = arith.constant 0 : index
    %c0_16 = arith.constant 0 : index
    %20 = vector.load %arg7[%c0_15, %c0_16] : memref<1x128xf32, #tpu.memory_space<vmem>>, vector<1x128xf32>
    %21 = vector.broadcast %20 : vector<1x128xf32> to vector<2x128xf32>
    %22 = arith.addf %19, %21 : vector<2x128xf32>
    %23 = arith.truncf %22 : vector<2x128xf32> to vector<2x128xbf16>
    %c0_17 = arith.constant 0 : index
    %c0_18 = arith.constant 0 : index
    %24 = vector.load %arg8[%c0_17, %c0_18] : memref<2x128xbf16, #tpu.memory_space<vmem>>, vector<2x128xbf16>
    tpu.vector_store %arg8[%c0_17, %c0_18], %23 {strides = array<i32>} : memref<2x128xbf16, #tpu.memory_space<vmem>>, vector<2x128xbf16>,
    return
  }
  func.func @transform_0(%arg0: i32) -> (i32, i32) {
    %c0_i32 = arith.constant 0 : i32
    %c0_i32_0 = arith.constant 0 : i32
    return %arg0, %c0_i32 : i32, i32
  }
  func.func @transform_1(%arg0: i32) -> (i32, i32) {
    %c0_i32 = arith.constant 0 : i32
    %c0_i32_0 = arith.constant 0 : i32
    %c0_i32_1 = arith.constant 0 : i32
    return %c0_i32, %c0_i32_0 : i32, i32
  }
  func.func @transform_2(%arg0: i32) -> (i32, i32) {
    %c0_i32 = arith.constant 0 : i32
    %c0_i32_0 = arith.constant 0 : i32
    %c0_i32_1 = arith.constant 0 : i32
    return %c0_i32, %c0_i32_0 : i32, i32
  }
  func.func @transform_3(%arg0: i32) -> (i32, i32) {
    %c0_i32 = arith.constant 0 : i32
    %c0_i32_0 = arith.constant 0 : i32
    %c0_i32_1 = arith.constant 0 : i32
    return %c0_i32, %c0_i32_0 : i32, i32
  }
  func.func @transform_4(%arg0: i32) -> (i32, i32) {
    %c0_i32 = arith.constant 0 : i32
    %c0_i32_0 = arith.constant 0 : i32
    %c0_i32_1 = arith.constant 0 : i32
    return %c0_i32, %c0_i32_0 : i32, i32
  }
  func.func @transform_5(%arg0: i32) -> (i32, i32) {
    %c0_i32 = arith.constant 0 : i32
    %c0_i32_0 = arith.constant 0 : i32
    %c0_i32_1 = arith.constant 0 : i32
    return %c0_i32, %c0_i32_0 : i32, i32
  }
  func.func @transform_6(%arg0: i32) -> (i32, i32) {
    %c0_i32 = arith.constant 0 : i32
    %c0_i32_0 = arith.constant 0 : i32
    %c0_i32_1 = arith.constant 0 : i32
    return %c0_i32, %c0_i32_0 : i32, i32
  }
  func.func @transform_7(%arg0: i32) -> (i32, i32) {
    %c0_i32 = arith.constant 0 : i32
    %c0_i32_0 = arith.constant 0 : i32
    return %arg0, %c0_i32 : i32, i32
  }
}

</mosaic_0001>

<bundles_post_ra>
// kernel: tpu_custom_call.1
= control target key start
LH: loop header
LB: loop body
LE: loop exit
PB: predicated region body
PF: predicated region fallthrough
CT: control target
= control target key end

     0   :  { %12 = vsyncpa [#allocation3], 0  ;;  %s765_s0 = inlined_call_operand.hbm [shape: f32[2,16], index: 0, kind: input, shape index: {}]   ;;  %s766_s1 = inlined_call_operand.hbm [shape: bf16[16,128], index: 1, kind: input, shape index: {}]   ;;  %s767_s2 = inlined_call_operand.vmem [shape: f32[1,128], index: 2, kind: input, shape index: {}]   ;;  %s768_s3 = inlined_call_operand.hbm [shape: bf16[128,128], index: 3, kind: input, shape index: {}]   ;;  %s769_s4 = inlined_call_operand.vmem [shape: f32[1,128], index: 4, kind: input, shape index: {}]   ;;  %s770_s5 = inlined_call_operand.hbm [shape: bf16[128,128], index: 5, kind: input, shape index: {}]   ;;  %s771_s6 = inlined_call_operand.vmem [shape: f32[1,128], index: 6, kind: input, shape index: {}]   ;;  %s772_s7 = inlined_call_operand.hbm [shape: bf16[2,128], index: 7, kind: output, shape index: {}]  }
   0x1   :  { %13 = vsyncpa [#allocation6], 0 }
   0x2   :  { %14 = vsyncpa [#allocation9], 0 }
   0x3   :  { %15 = vsyncpa [#allocation4], 0  ;;  %s618_s24 = smov [#allocation5]   ;;  %s500_s28 = scalar_lea.hbm %s766_s1, 128 }
   0x4   :  { %s31_s25 = sshll.u32 %s618_s24, 4  ;;  %p501_p0 = scmp.ne.s32.totalorder %s766_s1, %s500_s28  ;;  %s32_s25 = int_to_ptr.vmem [resolvable:$true] %s31_s25 }
   0x5   :  { %p504_p1 = scmp.lt.u32.totalorder %s500_s28, %s766_s1 }
   0x7   :  { %p506_p2 = pnand %p504_p1, %p501_p0 }
   0x9   :  { %509 = shalt.err (!%p506_p2)
}
   0xa   :  { %s510_s10 = scalar_lea.vmem %s32_s25, 128  ;;  %p515_p4 = scmp.lt.s32.totalorder %s32_s25, %s32_s25 }
   0xb   :  { %p511_p3 = scmp.ne.s32.totalorder %s32_s25, %s510_s10  ;;  %p516_p5 = scmp.lt.s32.totalorder %s510_s10, %s510_s10 }
   0xd   :  { %p517_p6 = por %p516_p5, %p515_p4 }
   0xf   :  { %p518_p7 = pnand %p517_p6, %p511_p3 }
  0x11   :  { %521 = shalt.err (!%p518_p7)
}
  0x12   :  { %s619_s11 = smov 64   ;;  %s620_s12 = smov 4  }
  0x13   :  { %37 = dma.hbm_to_vmem [thread:$0]  %s766_s1, 128, %s32_s25, [#allocation6], %s619_s11, %s619_s11, %s620_s12  }
  0x14   :  { %s621_s15 = smov [#allocation2]   ;;  %s622_s17 = smov [#allocation7]  }
  0x15   :  { %s22_s16 = sshll.u32 %s621_s15, 4  ;;  %s45_s18 = sshll.u32 %s622_s17, 4  ;;  %s23_s16 = int_to_ptr.vmem [resolvable:$true] %s22_s16  ;;  %s46_s18 = int_to_ptr.vmem [resolvable:$true] %s45_s18 }
  0x16   :  { %s522_s21 = scalar_lea.hbm %s765_s0, 32 }
  0x17   :  { %p523_p8 = scmp.ne.s32.totalorder %s765_s0, %s522_s21  ;;  %p526_p9 = scmp.lt.u32.totalorder %s522_s21, %s765_s0 }
  0x19   :  { %p528_p10 = pnand %p526_p9, %p523_p8 }
  0x1b   :  { %531 = shalt.err (!%p528_p10)
}
  0x1c   :  { %s532_s1 = scalar_lea.vmem %s23_s16, 32  ;;  %p537_p12 = scmp.lt.s32.totalorder %s23_s16, %s23_s16 }
  0x1d   :  { %p533_p11 = scmp.ne.s32.totalorder %s23_s16, %s532_s1  ;;  %p538_p13 = scmp.lt.s32.totalorder %s532_s1, %s532_s1 }
  0x1f   :  { %p539_p0 = por %p538_p13, %p537_p12 }
  0x21   :  { %p540_p1 = pnand %p539_p0, %p533_p11 }
  0x23   :  { %543 = shalt.err (!%p540_p1)
}
  0x24   :  { %25 = dma.hbm_to_vmem [thread:$0]  %s765_s0, 32, %s23_s16, [#allocation3]  }
  0x25   :  { %s544_s30 = scalar_lea.hbm %s768_s3, 1024 }
  0x26   :  { %p545_p2 = scmp.ne.s32.totalorder %s768_s3, %s544_s30  ;;  %p548_p3 = scmp.lt.u32.totalorder %s544_s30, %s768_s3 }
  0x28   :  { %p550_p4 = pnand %p548_p3, %p545_p2 }
  0x2a   :  { %553 = shalt.err (!%p550_p4)
}
  0x2b   :  { %s554_s14 = scalar_lea.vmem %s46_s18, 1024  ;;  %p559_p6 = scmp.lt.s32.totalorder %s46_s18, %s46_s18 }
  0x2c   :  { %p555_p5 = scmp.ne.s32.totalorder %s46_s18, %s554_s14  ;;  %p560_p7 = scmp.lt.s32.totalorder %s554_s14, %s554_s14 }
  0x2e   :  { %p561_p8 = por %p560_p7, %p559_p6 }
  0x30   :  { %p562_p9 = pnand %p561_p8, %p555_p5 }
  0x32   :  { %565 = shalt.err (!%p562_p9)
}
  0x33   :  { %51 = dma.hbm_to_vmem [thread:$0]  %s768_s3, 1024, %s46_s18, [#allocation6], %s619_s11, %s619_s11, %s620_s12  }
  0x34   :  { %s623_s16 = smov [#allocation8]   ;;  %s566_s21 = scalar_lea.hbm %s770_s5, 1024 }
  0x35   :  { %s59_s17 = sshll.u32 %s623_s16, 4  ;;  %p567_p10 = scmp.ne.s32.totalorder %s770_s5, %s566_s21  ;;  %s60_s17 = int_to_ptr.vmem [resolvable:$true] %s59_s17 }
  0x36   :  { %p570_p11 = scmp.lt.u32.totalorder %s566_s21, %s770_s5 }
  0x38   :  { %p572_p12 = pnand %p570_p11, %p567_p10 }
  0x3a   :  { %575 = shalt.err (!%p572_p12)
}
  0x3b   :  { %s576_s1 = scalar_lea.vmem %s60_s17, 1024  ;;  %p581_p0 = scmp.lt.s32.totalorder %s60_s17, %s60_s17 }
  0x3c   :  { %p577_p13 = scmp.ne.s32.totalorder %s60_s17, %s576_s1  ;;  %p582_p1 = scmp.lt.s32.totalorder %s576_s1, %s576_s1 }
  0x3e   :  { %p583_p2 = por %p582_p1, %p581_p0 }
  0x40   :  { %p584_p3 = pnand %p583_p2, %p577_p13 }
  0x42   :  { %587 = shalt.err (!%p584_p3)
}
  0x43   :  { %65 = dma.hbm_to_vmem [thread:$0]  %s770_s5, 1024, %s60_s17, [#allocation9], %s619_s11, %s619_s11, %s620_s12  }
  0x44   :  { %610 = dma.done.wait [#allocation3], 32  }
  0x45   :  { %611 = vsyncadd [#allocation3], 4294967264 }
  0x46   :  { %612 = dma.done.wait [#allocation6], 1152  }
  0x47   :  { %613 = vsyncadd [#allocation6], 4294966144 }
  0x48   :  { %614 = dma.done.wait [#allocation9], 1024  }
  0x49   :  { %615 = vsyncadd [#allocation9], 4294966272  ;;  %v624_v0 = vmov 0.0   ;;  %vm625_vm0 = vmmov 0   ;;  %v483_v1 = vld [vmem:[#allocation5] sm:$0xff]   ;;  %vm98_vm1 = vcmask 130048  }
  0x4a   :  { %428 = vmatprep.subr.bf16.mxu0 %v624_v0  ;;  %430 = vmatprep.mubr.msk.bf16.mxu0 %vm625_vm0, %v624_v0  ;;  %v81_v2 = vld [vmem:[#allocation2] sm:$0x3]  ;;  %v484_v4 = vld [vmem:[#allocation7] sm:$0xff]   ;;  %v485_v5 = vld [vmem:[#allocation7 + $0x8] sm:$0xff]   ;;  %s626_s28 = smov [#allocation10]  }
  0x4b   :  { %434 = vmatprep.subr.bf16.mxu1 %v624_v0  ;;  %450 = vmatprep.mubr.msk.bf16.mxu1 %vm625_vm0, %v624_v0  ;;  %v82_v3 = vpack.c.bf16 %v81_v2, %v81_v2  ;;  %v486_v6 = vld [vmem:[#allocation7 + $0x10] sm:$0xff]   ;;  %v487_v7 = vld [vmem:[#allocation7 + $0x18] sm:$0xff]   ;;  %v488_v8 = vld [vmem:[#allocation7 + $0x20] sm:$0xff]   ;;  %s376_s29 = sshll.u32 %s626_s28, 4  ;;  %s377_s29 = int_to_ptr.vmem [resolvable:$true] %s376_s29 }
  0x4c   :  { %429 = vmatpush3.bf16.msra.mxu0 %v483_v1  ;;  %435 = vmatpush3.bf16.msra.mxu1 %v484_v4  ;;  %v489_v9 = vld [vmem:[#allocation7 + $0x28] sm:$0xff]   ;;  %v490_v10 = vld [vmem:[#allocation7 + $0x30] sm:$0xff]   ;;  %v491_v11 = vld [vmem:[#allocation7 + $0x38] sm:$0xff]   ;;  %s592_s30 = scalar_lea.vmem %s377_s29, 32  ;;  %p593_p5 = scmp.lt.s32.totalorder %s377_s29, %s377_s29 }
  0x4d   :  { %454 = vmatprep.subr.bf16.mxu0 %v624_v0  ;;  %436 = vmatprep.subr.bf16.mxu1 %v624_v0  ;;  %v492_v12 = vld [vmem:[#allocation8] sm:$0xff]   ;;  %v493_v13 = vld [vmem:[#allocation8 + $0x8] sm:$0xff]   ;;  %v494_v14 = vld [vmem:[#allocation8 + $0x10] sm:$0xff]  }
  0x4e   :  { %v495_v15 = vld [vmem:[#allocation8 + $0x18] sm:$0xff]   ;;  %v496_v16 = vld [vmem:[#allocation8 + $0x20] sm:$0xff]   ;;  %v497_v17 = vld [vmem:[#allocation8 + $0x28] sm:$0xff]  }
  0x4f   :  { %431 = vmatmul.mubr.msk.bf16.vlgmr.msra.gmra.mrb[0].mxu0 %vm98_vm1, %v82_v3  ;;  %v387_v18 = vld [vmem:[%s767_s2] ss:$0 sm:$0xff]  ;;  %v499_v27 = vld [vmem:[#allocation8 + $0x38] sm:$0xff]  }
  0x50   :  { %470 = vmatprep.mubr.msk.bf16.mxu0 %vm625_vm0, %v624_v0  ;;  %437 = vmatpush3.bf16.msra.mxu1 %v485_v5  ;;  %v498_v26 = vld [vmem:[#allocation8 + $0x30] sm:$0xff]  }
  0x51   :  { %438 = vmatprep.subr.bf16.mxu1 %v624_v0  ;;  %455 = vmatpush3.bf16.msra.mxu0 %v492_v12  ;;  %v390_v28 = vld [vmem:[%s769_s4] ss:$0 sm:$0xff]  ;;  %s588_s4 = scalar_lea.vmem %s377_s29, 16 }
  0x52   :  { %456 = vmatprep.subr.bf16.mxu0 %v624_v0  ;;  %v399_v36 = vld [vmem:[%s771_s6] ss:$0 sm:$0xff]  ;;  %p589_p4 = scmp.ne.s32.totalorder %s377_s29, %s588_s4  ;;  %p594_p6 = scmp.lt.s32.totalorder %s592_s30, %s588_s4 }
  0x54   :  { %439 = vmatpush3.bf16.msra.mxu1 %v486_v6  ;;  %p595_p7 = por %p594_p6, %p593_p5 }
  0x55   :  { %440 = vmatprep.subr.bf16.mxu1 %v624_v0  ;;  %457 = vmatpush3.bf16.msra.mxu0 %v493_v13 }
  0x56   :  { %458 = vmatprep.subr.bf16.mxu0 %v624_v0  ;;  %p596_p8 = pnand %p595_p7, %p589_p4 }
  0x58   :  { %441 = vmatpush3.bf16.msra.mxu1 %v487_v7 }
  0x59   :  { %442 = vmatprep.subr.bf16.mxu1 %v624_v0  ;;  %459 = vmatpush3.bf16.msra.mxu0 %v494_v14 }
  0x5a   :  { %460 = vmatprep.subr.bf16.mxu0 %v624_v0 }
  0x5c   :  { %443 = vmatpush3.bf16.msra.mxu1 %v488_v8 }
  0x5d   :  { %444 = vmatprep.subr.bf16.mxu1 %v624_v0  ;;  %461 = vmatpush3.bf16.msra.mxu0 %v495_v15 }
  0x5e   :  { %462 = vmatprep.subr.bf16.mxu0 %v624_v0 }
  0x60   :  { %445 = vmatpush3.bf16.msra.mxu1 %v489_v9 }
  0x61   :  { %446 = vmatprep.subr.bf16.mxu1 %v624_v0  ;;  %463 = vmatpush3.bf16.msra.mxu0 %v496_v16 }
  0x62   :  { %464 = vmatprep.subr.bf16.mxu0 %v624_v0 }
  0x64   :  { %447 = vmatpush3.bf16.msra.mxu1 %v490_v10 }
  0x65   :  { %448 = vmatprep.subr.bf16.mxu1 %v624_v0  ;;  %465 = vmatpush3.bf16.msra.mxu0 %v497_v17 }
  0x66   :  { %466 = vmatprep.subr.bf16.mxu0 %v624_v0 }
  0x68   :  { %449 = vmatpush3.bf16.msra.mxu1 %v491_v11 }
  0x69   :  { %467 = vmatpush3.bf16.msra.mxu0 %v498_v26 }
  0x6a   :  { %468 = vmatprep.subr.bf16.mxu0 %v624_v0 }
  0x6d   :  { %469 = vmatpush3.bf16.msra.mxu0 %v499_v27 }
 0x122   :  { %v136_v19 = vpop.f32.mrb[0].mxu0 }
 0x123   :  { %v137_v20 = vadd.f32 %v387_v18, %v136_v19  ;;  %v432_v21 = vpop.f32.mrb[1].mxu0 }
 0x124   :  { %v139_v22 = vpop.f32.mrb[2].mxu0 }
 0x125   :  { %v142_v23 = vmax.f32 %v137_v20, 0.0  ;;  %v433_v24 = vpop.f32.mrb[3].mxu0 }
 0x127   :  { %v143_v25 = vpack.c.bf16 %v142_v23, %v142_v23 }
 0x129   :  { %451 = vmatmul.mubr.bf16.vlgmr.msra.gmra.mrb[0].mxu1 %v143_v25 }
 0x1fc   :  { %v249_v29 = vpop.f32.mrb[0].mxu1 }
 0x1fd   :  { %v250_v30 = vadd.f32 %v390_v28, %v249_v29  ;;  %v452_v31 = vpop.f32.mrb[1].mxu1 }
 0x1fe   :  { %v252_v32 = vpop.f32.mrb[2].mxu1 }
 0x1ff   :  { %v255_v33 = vmax.f32 %v250_v30, 0.0  ;;  %v453_v34 = vpop.f32.mrb[3].mxu1 }
 0x201   :  { %v256_v35 = vpack.c.bf16 %v255_v33, %v255_v33 }
 0x203   :  { %471 = vmatmul.mubr.bf16.vlgmr.msra.gmra.mrb[4].mxu0 %v256_v35 }
 0x2d6   :  { %v362_v37 = vpop.f32.mrb[4].mxu0 }
 0x2d7   :  { %v363_v38 = vadd.f32 %v399_v36, %v362_v37  ;;  %v472_v39 = vpop.f32.mrb[5].mxu0 }
 0x2d8   :  { %v365_v40 = vpop.f32.mrb[6].mxu0 }
 0x2d9   :  { %v368_v41 = vpack.c.bf16 %v363_v38, %v363_v38  ;;  %v473_v42 = vpop.f32.mrb[7].mxu0 }
 0x2db   :  { %369 = vst [vmem:[#allocation10] sm:$0x1] %v368_v41 }
 0x2dc   :  { %599 = shalt.err (!%p596_p8)
}
 0x2dd   :  { %s600_s9 = scalar_lea.hbm %s772_s7, 16 }
 0x2de   :  { %p601_p9 = scmp.ne.s32.totalorder %s772_s7, %s600_s9  ;;  %p604_p10 = scmp.lt.u32.totalorder %s600_s9, %s772_s7 }
 0x2e0   :  { %p606_p11 = pnand %p604_p10, %p601_p9 }
 0x2e2   :  { %609 = shalt.err (!%p606_p11)
}
 0x2e3   :  { %379 = dma.vmem_to_hbm [thread:$0]  %s377_s29, 16, %s772_s7, [#allocation4]  }
 0x2e4   :  { %616 = dma.done.wait [#allocation4], 16  }
 0x2e5   :  { %617 = vsyncadd [#allocation4], 4294967280 }
 0x2e6   :  { %383 = vsyncpa [#allocation3], 1 }
 0x2e7   :  { %384 = vsyncpa [#allocation6], 1 }
 0x2e8   :  { %385 = vsyncpa [#allocation9], 1 }
 0x2e9   :  { %386 = vsyncpa [#allocation4], 1 }

</bundles_post_ra>
